<compile_context>
chip_gen: v5e
topology: v5e:2x2
jax: 0.10.0
libtpu: 0.0.40
codegen_flags: <defaults>
</compile_context>

<pallas_src>
import math

import jax
import jax.numpy as jnp
from jax import lax
from jax.experimental import pallas as pl
from jax.experimental.pallas import tpu as pltpu


def _round_up(x: int, m: int) -> int:
    return ((x + m - 1) // m) * m


def _vmem_capacity_bytes() -> int:
    try:
        return int(pltpu.get_tpu_info().vmem_capacity_bytes)
    except Exception:
        return 64 << 20  # conservative (v7x-sized) fallback


def _make_kernel(inv_temperature, lk, lk_pad, has_mask, mm_dtype):
    """Per-(batch, query-tile) attention kernel. Block views are rank-3 with a
    leading squeezable batch dim of 1."""

    def kernel(*refs):
        if has_mask:
            q_ref, k_ref, v_ref, oa_ref, m_ref, out_ref, attn_ref = refs
        else:
            q_ref, k_ref, v_ref, oa_ref, out_ref, attn_ref = refs
            m_ref = None

        f32 = jnp.float32
        padded = lk_pad != lk
        valid = None
        if padded:
            # Hoisted once; reused by both softmaxes that need it.
            valid = lax.broadcasted_iota(jnp.int32, (oa_ref.shape[1], lk_pad), 1) < lk

        # ---- phase 1: softmax(original_attention) -> attn_ref ---------------
        oa = oa_ref[0].astype(f32)                              # (TQ, Lk_pad)
        if padded:
            oa = jnp.where(valid, oa, -jnp.inf)                 # kill pad columns
        oa = jnp.exp(oa - jnp.max(oa, axis=-1, keepdims=True))
        oa = oa * pl.reciprocal(jnp.sum(oa, axis=-1, keepdims=True), approx=False)
        attn_ref[0] = oa.astype(attn_ref.dtype)
        # oa is now dead -> its slabs are free for the score path below.

        # ---- phase 2: softmax(q k^T / T), accumulate into attn --------------
        q = q_ref[0]                                            # (TQ, D_pad)
        k = k_ref[0]                                            # (Lk_pad, D_pad)
        if mm_dtype is not None:
            q = q.astype(mm_dtype)
            k = k.astype(mm_dtype)
        # Contract last dims directly (no XLU transpose), f32 accumulation on
        # the MXU; fold 1/T into the f32 accumulator instead of scaling q.
        s = lax.dot_general(q, k, (((1,), (1,)), ((), ())),
                            preferred_element_type=f32)         # (TQ, Lk_pad)
        s = s * f32(inv_temperature)
        if m_ref is not None:
            # masked_fill(mask == 0, -1e9).  Padded key columns carry mask==0
            # (zero-padded), so the padding mask is folded into this select;
            # exp(-1e9 - rowmax) underflows to exactly 0 in any non-degenerate
            # row, matching the separate -inf mask.
            s = jnp.where(m_ref[0] == 0, f32(-1.0e9), s)
        elif padded:
            s = jnp.where(valid, s, -jnp.inf)
        s = jnp.exp(s - jnp.max(s, axis=-1, keepdims=True))
        p = s * pl.reciprocal(jnp.sum(s, axis=-1, keepdims=True), approx=False)

        # attn = softmax(original) + dropout(softmax(scores))   [eval: identity]
        attn = attn_ref[0].astype(f32) + p                      # (TQ, Lk_pad)
        attn_ref[0] = attn.astype(attn_ref.dtype)

        # output = attn @ v  (probabilities in v's / MXU dtype, f32 accumulate)
        v = v_ref[0]                                            # (Lk_pad, Dv_pad)
        pv_dtype = v.dtype if mm_dtype is None else mm_dtype
        out = jnp.dot(attn.astype(pv_dtype), v.astype(pv_dtype),
                      preferred_element_type=f32)               # (TQ, Dv_pad)
        out_ref[0] = out.astype(out_ref.dtype)

    return kernel


def scaled_dot_product_attention_hyper(q, k, v, original_attention, feature,
                                       mask=None, *, temperature,
                                       mxu_dtype=None):
    """JAX/Pallas equivalent of ScaledDotProductAttention_hyper.forward.

    mxu_dtype: optional (e.g. jnp.bfloat16) to run f32 matmuls through the MXU
    at reduced precision (f32 accumulation kept).  Default None = exact dtype.
    """
    B, Lq, D = q.shape
    _, Lk, _ = k.shape
    Dv = v.shape[-1]
    out_dtype = q.dtype

    # Glue: permute happens BEFORE the softmax in the reference module, so
    # doing it here preserves semantics exactly.  (Literal `!= True` to match
    # the PyTorch condition for non-bool truthy values.)
    if feature != True:  # noqa: E712
        original_attention = jnp.transpose(original_attention, (0, 2, 1))
    assert original_attention.shape == (B, Lq, Lk)

    has_mask = mask is not None

    # ---- lane padding --------------------------------------------------------
    D_pad = _round_up(D, 128)
    Dv_pad = _round_up(Dv, 128)
    Lk_pad = _round_up(Lk, 128)

    itm = jnp.dtype(q.dtype).itemsize
    itm_o = jnp.dtype(out_dtype).itemsize

    # Mask handling: only pay a cast/pad HBM pass when we need one anyway.
    if has_mask:
        mask_int8 = (Lk_pad != Lk) or jnp.issubdtype(mask.dtype, jnp.bool_)
        mask_itm = 1 if mask_int8 else jnp.dtype(mask.dtype).itemsize
    else:
        mask_int8 = False
        mask_itm = 0

    # k/v are resident per batch; the pipeline double-buffers them (their block
    # index only changes at batch boundaries).
    kv_resident = 2 * (Lk_pad * D_pad + Lk_pad * Dv_pad) * itm

    def tq_bytes(tq):  # TQ-dependent VMEM per grid step (double-buffered tiles
        b = 2 * tq * D_pad * itm                         # q tile
        b += 2 * tq * Lk_pad * itm_o                     # original_attention tile
        if has_mask:
            b += 2 * tq * Lk_pad * mask_itm              # mask tile
        b += 2 * (tq * Lk_pad + tq * Dv_pad) * itm_o     # attn + out tiles
        b += 3 * tq * Lk_pad * 4 + tq * Dv_pad * 4       # live in-kernel f32 slabs
        return b

    # ---- generation-aware VMEM budget & query tile ---------------------------
    vmem_cap = _vmem_capacity_bytes()
    budget_cap = min(vmem_cap // 2, 48 << 20)            # ~32 MiB v7x, 48 MiB v5e/v6e
    tq_budget = max(budget_cap - kv_resident, 4 << 20)   # k/v excluded: shrinking TQ
                                                          # never reduces it.
    # Query tile: multiple of 32 (legal for int8/bf16 packed blocks), capped at
    # 256 to fill the 256-wide MXU on v6e/v7x when VMEM allows.
    TQ = min(_round_up(Lq, 32), 256)
    while TQ > 32 and tq_bytes(TQ) > tq_budget:
        TQ = max(32, _round_up(TQ // 2, 32))
    Lq_pad = _round_up(Lq, TQ)
    num_q_tiles = Lq_pad // TQ

    def pad3(x, s1, s2):
        p1, p2 = s1 - x.shape[1], s2 - x.shape[2]
        if p1 or p2:
            x = jnp.pad(x, ((0, 0), (0, p1), (0, p2)))
        return x

    q_p = pad3(q, Lq_pad, D_pad)
    k_p = pad3(k, Lk_pad, D_pad)
    v_p = pad3(v, Lk_pad, Dv_pad)
    oa = original_attention
    if oa.dtype != out_dtype:
        oa = oa.astype(out_dtype)        # stream the (B,Lq,Lk) plane at out dtype
    oa_p = pad3(oa, Lq_pad, Lk_pad)
    # NOTE: the pad/cast ops above are left to XLA to fuse into a single HBM
    # pass; when shapes are already aligned they are no-ops.

    inputs = [q_p, k_p, v_p, oa_p]
    in_specs = [
        pl.BlockSpec((1, TQ, D_pad), lambda b, i: (b, i, 0)),
        pl.BlockSpec((1, Lk_pad, D_pad), lambda b, i: (b, 0, 0)),   # resident k
        pl.BlockSpec((1, Lk_pad, Dv_pad), lambda b, i: (b, 0, 0)),  # resident v
        pl.BlockSpec((1, TQ, Lk_pad), lambda b, i: (b, i, 0)),
    ]
    if has_mask:
        m = (mask != 0).astype(jnp.int8) if mask_int8 else mask
        m_p = pad3(m, Lq_pad, Lk_pad)     # zero-padded -> padded cols stay masked
        inputs.append(m_p)
        in_specs.append(pl.BlockSpec((1, TQ, Lk_pad), lambda b, i: (b, i, 0)))

    kernel = _make_kernel(1.0 / float(temperature), Lk, Lk_pad, has_mask,
                          mxu_dtype)

    need = tq_bytes(TQ) + kv_resident + (2 << 20)
    vmem_limit = int(min(max(need, 16 << 20), int(vmem_cap * 0.9)))

    out_p, attn_p = pl.pallas_call(
        kernel,
        out_shape=(
            jax.ShapeDtypeStruct((B, Lq_pad, Dv_pad), out_dtype),
            jax.ShapeDtypeStruct((B, Lq_pad, Lk_pad), out_dtype),
        ),
        grid=(B, num_q_tiles),
        in_specs=in_specs,
        out_specs=(
            pl.BlockSpec((1, TQ, Dv_pad), lambda b, i: (b, i, 0)),
            pl.BlockSpec((1, TQ, Lk_pad), lambda b, i: (b, i, 0)),
        ),
        compiler_params=pltpu.CompilerParams(
            dimension_semantics=("parallel", "parallel"),
            vmem_limit_bytes=vmem_limit,
        ),
    )(*inputs)

    # Strip padding (pure layout plumbing in the wrapper).
    out = out_p[:, :Lq, :Dv]
    attn = attn_p[:, :Lq, :Lk]
    return out, attn


def _reference(q, k, v, original_attention, feature, mask, temperature):
    """Plain-JAX reference matching the PyTorch forward (eval-mode dropout)."""
    attn = jnp.einsum("bqd,bkd->bqk", q / temperature, k)
    if mask is not None:
        attn = jnp.where(mask == 0, -1.0e9, attn)
    if feature != True:  # noqa: E712
        original_attention = jnp.transpose(original_attention, (0, 2, 1))
    oa = jax.nn.softmax(original_attention, axis=-1)
    attn = jax.nn.softmax(attn, axis=-1)
    attn = oa + attn
    out = jnp.einsum("bqk,bkv->bqv", attn, v)
    return out, attn


if __name__ == "__main__":
    TOL = dict(atol=5e-3, rtol=5e-3)
    key = jax.random.PRNGKey(0)

    # Case 1: small unaligned shapes, feature=False (oa comes in as (B,Lk,Lq)),
    # no mask -> exercises the padding / -inf column-mask path.
    B, Lq, Lk, D, Dv = 2, 8, 16, 32, 32
    temperature = math.sqrt(D)
    kq, kk, kv, ka, km = jax.random.split(key, 5)
    q = jax.random.normal(kq, (B, Lq, D), dtype=jnp.float32)
    k = jax.random.normal(kk, (B, Lk, D), dtype=jnp.float32)
    v = jax.random.normal(kv, (B, Lk, Dv), dtype=jnp.float32)
    oa_f = jax.random.normal(ka, (B, Lk, Lq), dtype=jnp.float32)

    out, attn = scaled_dot_product_attention_hyper(
        q, k, v, oa_f, False, None, temperature=temperature)
    jax.block_until_ready((out, attn))
    ref_out, ref_attn = _reference(q, k, v, oa_f, False, None, temperature)
    assert out.shape == (B, Lq, Dv) and attn.shape == (B, Lq, Lk)
    assert jnp.allclose(out, ref_out, **TOL)
    assert jnp.allclose(attn, ref_attn, **TOL)

    # Case 2: feature=True (oa already (B,Lq,Lk)), with mask -> exercises the
    # int8-mask + folded padding-mask path.
    oa_t = jax.random.normal(ka, (B, Lq, Lk), dtype=jnp.float32)
    mask = (jax.random.uniform(km, (B, Lq, Lk)) > 0.3).astype(jnp.int32)
    out2, attn2 = scaled_dot_product_attention_hyper(
        q, k, v, oa_t, True, mask, temperature=temperature)
    jax.block_until_ready((out2, attn2))
    ref_out2, ref_attn2 = _reference(q, k, v, oa_t, True, mask, temperature)
    assert jnp.allclose(out2, ref_out2, **TOL)
    assert jnp.allclose(attn2, ref_attn2, **TOL)

    # Case 3: lane-aligned shapes with a mask -> exercises the no-padding
    # mask-passthrough (no extra HBM cast pass) path.
    B3, Lq3, Lk3, D3, Dv3 = 2, 64, 128, 128, 128
    t3 = math.sqrt(D3)
    k3q, k3k, k3v, k3a, k3m = jax.random.split(jax.random.PRNGKey(0), 5)
    q3 = jax.random.normal(k3q, (B3, Lq3, D3), dtype=jnp.float32)
    k3 = jax.random.normal(k3k, (B3, Lk3, D3), dtype=jnp.float32)
    v3 = jax.random.normal(k3v, (B3, Lk3, Dv3), dtype=jnp.float32)
    oa3 = jax.random.normal(k3a, (B3, Lq3, Lk3), dtype=jnp.float32)
    mask3 = (jax.random.uniform(k3m, (B3, Lq3, Lk3)) > 0.2).astype(jnp.int32)
    out3, attn3 = scaled_dot_product_attention_hyper(
        q3, k3, v3, oa3, True, mask3, temperature=t3)
    jax.block_until_ready((out3, attn3))
    ref_out3, ref_attn3 = _reference(q3, k3, v3, oa3, True, mask3, t3)
    assert jnp.allclose(out3, ref_out3, **TOL)
    assert jnp.allclose(attn3, ref_attn3, **TOL)

    print("KERNEL_OK")
</pallas_src>

<mosaic_0001>
module attributes {stable_mosaic.version = 11 : i64} {
  func.func @kernel(%arg0: i32, %arg1: i32, %arg2: memref<1x32x128xf32, #tpu.memory_space<vmem>>, %arg3: memref<1x128x128xf32, #tpu.memory_space<vmem>>, %arg4: memref<1x128x128xf32, #tpu.memory_space<vmem>>, %arg5: memref<1x32x128xf32, #tpu.memory_space<vmem>>, %arg6: memref<1x32x128xf32, #tpu.memory_space<vmem>>, %arg7: memref<1x32x128xf32, #tpu.memory_space<vmem>>) attributes {dimension_semantics = [#tpu.dimension_semantics<parallel>, #tpu.dimension_semantics<parallel>], iteration_bounds = array<i64: 2, 1>, scalar_prefetch = 0 : i64, scratch_operands = 0 : i64, tpu.core_type = #tpu.core_type<tc>, window_params = [{transform_indices = @transform_0, window_bounds = array<i64: 1, 32, 128>}, {transform_indices = @transform_1, window_bounds = array<i64: 1, 128, 128>}, {transform_indices = @transform_2, window_bounds = array<i64: 1, 128, 128>}, {transform_indices = @transform_3, window_bounds = array<i64: 1, 32, 128>}, {transform_indices = @transform_4, window_bounds = array<i64: 1, 32, 128>}, {transform_indices = @transform_5, window_bounds = array<i64: 1, 32, 128>}]} {
    %0 = tpu.iota {dimensions = array<i32: 1>} : vector<32x128xi32>
    %c16_i32 = arith.constant 16 : i32
    %1 = vector.broadcast %c16_i32 : i32 to vector<32x128xi32>
    %2 = arith.cmpi slt, %0, %1 : vector<32x128xi32>
    %c0 = arith.constant 0 : index
    %c0_0 = arith.constant 0 : index
    %c0_1 = arith.constant 0 : index
    %3 = vector.load %arg5[%c0, %c0_0, %c0_1] : memref<1x32x128xf32, #tpu.memory_space<vmem>>, vector<1x32x128xf32>
    %4 = vector.shape_cast %3 : vector<1x32x128xf32> to vector<32x128xf32>
    %cst = arith.constant 0xFF800000 : f32
    %5 = vector.broadcast %cst : f32 to vector<32x128xf32>
    %6 = arith.select %2, %4, %5 : vector<32x128xi1>, vector<32x128xf32>
    %cst_2 = arith.constant dense<0xFF800000> : vector<32xf32>
    %7 = vector.multi_reduction <maximumf>, %6, %cst_2 [1] : vector<32x128xf32> to vector<32xf32>
    %8 = vector.shape_cast %7 : vector<32xf32> to vector<32x1xf32>
    %9 = vector.broadcast %8 : vector<32x1xf32> to vector<32x128xf32>
    %10 = arith.subf %6, %9 : vector<32x128xf32>
    %11 = math.exp %10 : vector<32x128xf32>
    %cst_3 = arith.constant dense<0.000000e+00> : vector<32xf32>
    %12 = vector.multi_reduction <add>, %11, %cst_3 [1] : vector<32x128xf32> to vector<32xf32>
    %13 = vector.shape_cast %12 : vector<32xf32> to vector<32x1xf32>
    %14 = tpu.reciprocal %13 : vector<32x1xf32> -> vector<32x1xf32>
    %15 = vector.broadcast %14 : vector<32x1xf32> to vector<32x128xf32>
    %16 = arith.mulf %11, %15 : vector<32x128xf32>
    %c0_4 = arith.constant 0 : index
    %c0_5 = arith.constant 0 : index
    %c0_6 = arith.constant 0 : index
    %17 = vector.load %arg7[%c0_4, %c0_5, %c0_6] : memref<1x32x128xf32, #tpu.memory_space<vmem>>, vector<1x32x128xf32>
    %18 = vector.shape_cast %17 : vector<1x32x128xf32> to vector<32x128xf32>
    %19 = vector.shape_cast %16 : vector<32x128xf32> to vector<1x32x128xf32>
    tpu.vector_store %arg7[%c0_4, %c0_5, %c0_6], %19 {strides = array<i32>} : memref<1x32x128xf32, #tpu.memory_space<vmem>>, vector<1x32x128xf32>,
    %c0_7 = arith.constant 0 : index
    %c0_8 = arith.constant 0 : index
    %c0_9 = arith.constant 0 : index
    %20 = vector.load %arg2[%c0_7, %c0_8, %c0_9] : memref<1x32x128xf32, #tpu.memory_space<vmem>>, vector<1x32x128xf32>
    %21 = vector.shape_cast %20 : vector<1x32x128xf32> to vector<32x128xf32>
    %c0_10 = arith.constant 0 : index
    %c0_11 = arith.constant 0 : index
    %c0_12 = arith.constant 0 : index
    %22 = vector.load %arg3[%c0_10, %c0_11, %c0_12] : memref<1x128x128xf32, #tpu.memory_space<vmem>>, vector<1x128x128xf32>
    %23 = vector.shape_cast %22 : vector<1x128x128xf32> to vector<128x128xf32>
    %cst_13 = arith.constant dense<0.000000e+00> : vector<32x128xf32>
    %24 = tpu.matmul %21, %23, %cst_13 {dimension_numbers = #tpu.dot_dimension_numbers<[1], [1], [0], [0], [0, 0, 1, 0], [], []>} : vector<32x128xf32>, vector<128x128xf32>, vector<32x128xf32> -> vector<32x128xf32>
    %cst_14 = arith.constant 0.176776692 : f32
    %25 = vector.broadcast %cst_14 : f32 to vector<32x128xf32>
    %26 = arith.mulf %24, %25 : vector<32x128xf32>
    %cst_15 = arith.constant 0xFF800000 : f32
    %27 = vector.broadcast %cst_15 : f32 to vector<32x128xf32>
    %28 = arith.select %2, %26, %27 : vector<32x128xi1>, vector<32x128xf32>
    %cst_16 = arith.constant dense<0xFF800000> : vector<32xf32>
    %29 = vector.multi_reduction <maximumf>, %28, %cst_16 [1] : vector<32x128xf32> to vector<32xf32>
    %30 = vector.shape_cast %29 : vector<32xf32> to vector<32x1xf32>
    %31 = vector.broadcast %30 : vector<32x1xf32> to vector<32x128xf32>
    %32 = arith.subf %28, %31 : vector<32x128xf32>
    %33 = math.exp %32 : vector<32x128xf32>
    %cst_17 = arith.constant dense<0.000000e+00> : vector<32xf32>
    %34 = vector.multi_reduction <add>, %33, %cst_17 [1] : vector<32x128xf32> to vector<32xf32>
    %35 = vector.shape_cast %34 : vector<32xf32> to vector<32x1xf32>
    %36 = tpu.reciprocal %35 : vector<32x1xf32> -> vector<32x1xf32>
    %37 = vector.broadcast %36 : vector<32x1xf32> to vector<32x128xf32>
    %38 = arith.mulf %33, %37 : vector<32x128xf32>
    %c0_18 = arith.constant 0 : index
    %c0_19 = arith.constant 0 : index
    %c0_20 = arith.constant 0 : index
    %39 = vector.load %arg7[%c0_18, %c0_19, %c0_20] : memref<1x32x128xf32, #tpu.memory_space<vmem>>, vector<1x32x128xf32>
    %40 = vector.shape_cast %39 : vector<1x32x128xf32> to vector<32x128xf32>
    %41 = arith.addf %40, %38 : vector<32x128xf32>
    %c0_21 = arith.constant 0 : index
    %c0_22 = arith.constant 0 : index
    %c0_23 = arith.constant 0 : index
    %42 = vector.load %arg7[%c0_21, %c0_22, %c0_23] : memref<1x32x128xf32, #tpu.memory_space<vmem>>, vector<1x32x128xf32>
    %43 = vector.shape_cast %42 : vector<1x32x128xf32> to vector<32x128xf32>
    %44 = vector.shape_cast %41 : vector<32x128xf32> to vector<1x32x128xf32>
    tpu.vector_store %arg7[%c0_21, %c0_22, %c0_23], %44 {strides = array<i32>} : memref<1x32x128xf32, #tpu.memory_space<vmem>>, vector<1x32x128xf32>,
    %c0_24 = arith.constant 0 : index
    %c0_25 = arith.constant 0 : index
    %c0_26 = arith.constant 0 : index
    %45 = vector.load %arg4[%c0_24, %c0_25, %c0_26] : memref<1x128x128xf32, #tpu.memory_space<vmem>>, vector<1x128x128xf32>
    %46 = vector.shape_cast %45 : vector<1x128x128xf32> to vector<128x128xf32>
    %cst_27 = arith.constant dense<0.000000e+00> : vector<32x128xf32>
    %47 = tpu.matmul %41, %46, %cst_27 {dimension_numbers = #tpu.dot_dimension_numbers<[1], [0], [0], [1], [0, 0, 1, 1], [], []>} : vector<32x128xf32>, vector<128x128xf32>, vector<32x128xf32> -> vector<32x128xf32>
    %c0_28 = arith.constant 0 : index
    %c0_29 = arith.constant 0 : index
    %c0_30 = arith.constant 0 : index
    %48 = vector.load %arg6[%c0_28, %c0_29, %c0_30] : memref<1x32x128xf32, #tpu.memory_space<vmem>>, vector<1x32x128xf32>
    %49 = vector.shape_cast %48 : vector<1x32x128xf32> to vector<32x128xf32>
    %50 = vector.shape_cast %47 : vector<32x128xf32> to vector<1x32x128xf32>
    tpu.vector_store %arg6[%c0_28, %c0_29, %c0_30], %50 {strides = array<i32>} : memref<1x32x128xf32, #tpu.memory_space<vmem>>, vector<1x32x128xf32>,
    return
  }
  func.func @transform_0(%arg0: i32, %arg1: i32) -> (i32, i32, i32) {
    %c0_i32 = arith.constant 0 : i32
    %c0_i32_0 = arith.constant 0 : i32
    return %arg0, %arg1, %c0_i32 : i32, i32, i32
  }
  func.func @transform_1(%arg0: i32, %arg1: i32) -> (i32, i32, i32) {
    %c0_i32 = arith.constant 0 : i32
    %c0_i32_0 = arith.constant 0 : i32
    %c0_i32_1 = arith.constant 0 : i32
    return %arg0, %c0_i32, %c0_i32_0 : i32, i32, i32
  }
  func.func @transform_2(%arg0: i32, %arg1: i32) -> (i32, i32, i32) {
    %c0_i32 = arith.constant 0 : i32
    %c0_i32_0 = arith.constant 0 : i32
    %c0_i32_1 = arith.constant 0 : i32
    return %arg0, %c0_i32, %c0_i32_0 : i32, i32, i32
  }
  func.func @transform_3(%arg0: i32, %arg1: i32) -> (i32, i32, i32) {
    %c0_i32 = arith.constant 0 : i32
    %c0_i32_0 = arith.constant 0 : i32
    return %arg0, %arg1, %c0_i32 : i32, i32, i32
  }
  func.func @transform_4(%arg0: i32, %arg1: i32) -> (i32, i32, i32) {
    %c0_i32 = arith.constant 0 : i32
    %c0_i32_0 = arith.constant 0 : i32
    return %arg0, %arg1, %c0_i32 : i32, i32, i32
  }
  func.func @transform_5(%arg0: i32, %arg1: i32) -> (i32, i32, i32) {
    %c0_i32 = arith.constant 0 : i32
    %c0_i32_0 = arith.constant 0 : i32
    return %arg0, %arg1, %c0_i32 : i32, i32, i32
  }
}

</mosaic_0001>

<bundles_post_ra>
// kernel: tpu_custom_call.1
= control target key start
LH: loop header
LB: loop body
LE: loop exit
PB: predicated region body
PF: predicated region fallthrough
CT: control target
= control target key end

     0   :  { %s1843_s0 = inlined_call_operand.hbm [shape: f32[2,32,128], index: 0, kind: input, shape index: {}]   ;;  %s1844_s1 = inlined_call_operand.hbm [shape: f32[2,128,128], index: 1, kind: input, shape index: {}]   ;;  %s1845_s2 = inlined_call_operand.hbm [shape: f32[2,128,128], index: 2, kind: input, shape index: {}]   ;;  %s1846_s3 = inlined_call_operand.hbm [shape: f32[2,32,128], index: 3, kind: input, shape index: {}]   ;;  %s1847_s4 = inlined_call_operand.hbm [shape: f32[2,32,128], index: 4, kind: output, shape index: {0}]   ;;  %s1848_s5 = inlined_call_operand.hbm [shape: f32[2,32,128], index: 5, kind: output, shape index: {1}]  }
   0x1   :  { %1852 = sst [smem:[#allocation22_spill]] %s1843_s0 }
   0x2   :  { %1853 = sst [smem:[#allocation23_spill]] %s1844_s1 }
   0x3   :  { %1854 = sst [smem:[#allocation24_spill]] %s1845_s2 }
   0x4   :  { %11 = vsyncpa [#allocation3], 0 }
   0x5   :  { %13 = vsyncpa [#allocation3 + $0x1], 0 }
   0x6   :  { %14 = vsyncpa [#allocation6], 0 }
   0x7   :  { %16 = vsyncpa [#allocation6 + $0x1], 0 }
   0x8   :  { %17 = vsyncpa [#allocation9], 0 }
   0x9   :  { %19 = vsyncpa [#allocation9 + $0x1], 0 }
   0xa   :  { %20 = vsyncpa [#allocation4], 0 }
   0xb   :  { %22 = vsyncpa [#allocation4 + $0x1], 0 }
   0xc   :  { %23 = vsyncpa [#allocation12], 0 }
   0xd   :  { %25 = vsyncpa [#allocation12 + $0x1], 0  ;;  %s1415_s18 = smov 0   ;;  %s1417_s19 = smov 0  }
   0xe   :  { %s1419_s20 = smov 0   ;;  %s1421_s21 = smov 0  }
   0xf   :  { %s1423_s22 = smov 0   ;;  %s1425_s23 = smov 0  }
  0x10 LB: > { %1855 = sst [smem:[#allocation18_spill]] %s1367_s20  ;;  %s1446_s24 = sadd.s32 4294967295, %s1379_s23   ;;  %s1379_s23 = sphi %s1425_s23, %s31_s23   ;;  %s1375_s22 = sphi %s1423_s22, %s1893_s22   ;;  %s1371_s21 = sphi %s1421_s21, %s1892_s21   ;;  %s1367_s20 = sphi %s1419_s20, %s1888_s20   ;;  %s1363_s19 = sphi %s1417_s19, %s1891_s19   ;;  %s1359_s18 = sphi %s1415_s18, %s1890_s18  }
  0x11   : > { %s951_s25 = sadd.s32 4294967294, %s1379_s23   ;;  %s43_s26 = sadd.s32 1, %s1375_s22 }
  0x12   : > { %s52_s27 = sadd.s32 1, %s1367_s20  ;;  %p45_p0 = scmp.ge.s32.totalorder %s43_s26, 2 }
  0x13   : > { %p59_p1 = scmp.ne.s32.totalorder %s1367_s20, %s1363_s19  ;;  %p60_p2 = scmp.eq.s32.totalorder %s1379_s23, 0 }
  0x14   : > { %p65_p3 = scmp.ne.s32.totalorder %s1363_s19, %s1359_s18  ;;  %s1895_s26 = smov (%p45_p0, %s43_s26), 0 }
  0x15   : > { %1856 = sst [smem:[#allocation19_spill]] %s1895_s26  ;;  %p1458_p4 = por %p60_p2, %p59_p1 }
  0x16   : > { %p66_p5 = scmp.eq.s32.totalorder %s1446_s24, 0  ;;  %s47_s29 = ssub.s32 %s1375_s22, %s1895_s26 }
  0x17   : > { %p171_p6 = scmp.eq.s32.totalorder %s1446_s24, 1  ;;  %p50_p7 = scmp.eq.s32.totalorder %s47_s29, 0 }
  0x18   : > { %p1466_p8 = por %p66_p5, %p65_p3  ;;  %p177_p10 = scmp.eq.s32.totalorder %s951_s25, 1 }
  0x19   : > { %p1470_p9 = por %p171_p6, %p59_p1  ;;  %p953_p12 = scmp.ge.s32.totalorder %s1379_s23, 2 }
  0x1a   : > { %s1475_s7 = scalar_select %p50_p7, %s1367_s20, %s52_s27  }
  0x1b   : > { %p1477_p11 = por %p177_p10, %p65_p3  ;;  %p1051_p13 = scmp.lt.s32.totalorder %s1379_s23, 2 }
  0x1c   : > { %1860 = sst [smem:[#allocation20_spill]] %s1475_s7  ;;  %s1484_s9 = sand.u32 1, %s1367_s20  }
  0x1d   : > { %s1861_s8 = scalar_select %p1477_p11, 1, 0 }
  0x1e   : > { %p1488_p0 = pnand %p1051_p13, %p1458_p4  ;;  %s249_s11 = sand.u32 1, %s1379_s23  }
  0x1f   : > { %1862 = sst [smem:[#allocation21_spill]] %s1861_s8  ;;  %s957_s12 = sshll.u32 %s1484_s9, 7 }
  0x20   : > { %s982_s13 = sshll.u32 %s1375_s22, 7  ;;  %s253_s14 = scalar_lea.vmem [#allocation5], %s957_s12 }
  0x21   : > { %s261_s15 = sshll.u32 %s253_s14, 4  ;;  %s1864_s1 = sld [smem:[#allocation23_spill]]  ;;  %s262_s15 = int_to_ptr.vmem [resolvable:$true] %s261_s15 }
  0x22   : > { %s1865_s2 = sld [smem:[#allocation24_spill]]  ;;  %s250_s7 = scalar_lea.sflag [#allocation6], %s249_s11 }
  0x23   : > { %s1381_s20 = smov 128   ;;  %s1382_s8 = smov 8  }
  0x24   : > { %s275_s16 = scalar_lea.vmem [#allocation7], %s957_s12  ;;  %p966_p1 = scmp.ge.s32.totalorder %s1379_s23, 1 }
  0x25   : > { %s283_s17 = sshll.u32 %s275_s16, 4  ;;  %p315_p2 = scmp.lt.s32.totalorder %s1379_s23, 3  ;;  %s284_s17 = int_to_ptr.vmem [resolvable:$true] %s283_s17 }
  0x26   : > { %s954_s11 = sshll.u32 %s1484_s9, 5  ;;  %s1867_s0 = sld [smem:[#allocation22_spill]] }
  0x27   : > { %s258_s25 = scalar_lea.hbm %s1864_s1, %s982_s13  ;;  %p1508_p3 = pnand %p966_p1, %p315_p2 }
  0x28   : > { %s259_s27 = sshll.u32 %s258_s25, 4  ;;  %s280_s26 = scalar_lea.hbm %s1865_s2, %s982_s13  ;;  %s260_s27 = int_to_ptr.hbm [resolvable:$true] %s259_s27 }
  0x29   : > { %1037 = dma.hbm_to_vmem [thread:$0]  (!%p1488_p0), %s260_s27, 2048, %s262_s15, %s250_s7, %s1381_s20, %s1381_s20, %s1382_s8  }
  0x2a   : > { %s281_s14 = sshll.u32 %s280_s26, 4  ;;  %s981_s25 = sshll.u32 %s1375_s22, 5  ;;  %s282_s14 = int_to_ptr.hbm [resolvable:$true] %s281_s14 }
  0x2b   : > { %s229_s15 = scalar_lea.vmem [#allocation2], %s954_s11  ;;  %s226_s16 = scalar_lea.sflag [#allocation3], %s1484_s9 }
  0x2c   : > { %s236_s26 = scalar_lea.hbm %s1867_s0, %s981_s25  ;;  %s239_s27 = sshll.u32 %s229_s15, 4  ;;  %s240_s27 = int_to_ptr.vmem [resolvable:$true] %s239_s27 }
  0x2d   : > { %s237_s12 = sshll.u32 %s236_s26, 4  ;;  %s304_s0 = scalar_lea.hbm %s1846_s3, %s981_s25  ;;  %s238_s12 = int_to_ptr.hbm [resolvable:$true] %s237_s12 }
  0x2e   : > { %1034 = dma.hbm_to_vmem [thread:$0]  (!%p1488_p0), %s238_s12, 512, %s240_s27, %s226_s16, %s1381_s20, %s1381_s20, %s1382_s8  }
  0x2f   : > { %1040 = dma.hbm_to_vmem [thread:$0]  (!%p1488_p0), %s282_s14, 2048, %s284_s17, %s250_s7, %s1381_s20, %s1381_s20, %s1382_s8  }
  0x30   : > { %s297_s26 = scalar_lea.vmem [#allocation8], %s954_s11  ;;  %s305_s15 = sshll.u32 %s304_s0, 4  ;;  %s306_s15 = int_to_ptr.hbm [resolvable:$true] %s305_s15 }
  0x31   : > { %s307_s1 = sshll.u32 %s297_s26, 4  ;;  %s294_s2 = scalar_lea.sflag [#allocation9], %s1484_s9  ;;  %s308_s1 = int_to_ptr.vmem [resolvable:$true] %s307_s1 }
  0x32   : > { %1043 = dma.hbm_to_vmem [thread:$0]  (!%p1488_p0), %s306_s15, 512, %s308_s1, %s294_s2, %s1381_s20, %s1381_s20, %s1382_s8  }
  0x33   : > { %319 = sbr.rel (%p1508_p3) target bundleno = 673 (0x2a1), region = 36  ;;  %s1540_s7 = sand.u32 (!%p1508_p3), 1, %s1363_s19  }
  0x34   : > { %s1543_s14 = sshll.u32 (!%p1508_p3), %s1540_s7, 5  ;;  %s322_s0 = scalar_lea.sflag (!%p1508_p3), [#allocation3], %s1540_s7 }
  0x35   : > { %s1547_s17 = scalar_lea.vmem (!%p1508_p3), [#allocation2], %s1543_s14 }
  0x38   : > { %1338 = dma.done.wait (%p1466_p8), %s322_s0, 512  }
  0x39   : > { %1340 = vsyncadd (%p1466_p8), %s322_s0, 4294966784  ;;  %s331_s1 = sand.u32 1, %s1446_s24   ;;  %s968_s2 = sshll.u32 %s1540_s7, 7 }
  0x3a   : > { %s332_s20 = scalar_lea.sflag [#allocation6], %s331_s1  ;;  %s1555_s8 = scalar_lea.vmem [#allocation5], %s968_s2 }
  0x3b   : > { %1342 = dma.done.wait (%p1466_p8), %s332_s20, 4096  }
  0x3c   : > { %1344 = vsyncadd (%p1466_p8), %s332_s20, 4294963200  ;;  %s1561_s9 = scalar_lea.vmem [#allocation7], %s968_s2  ;;  %s352_s10 = scalar_lea.sflag [#allocation9], %s1540_s7 }
  0x3d   : > { %s1565_s13 = scalar_lea.vmem [#allocation8], %s1543_s14 }
  0x3e   : > { %1346 = dma.done.wait (%p1466_p8), %s352_s10, 512  }
  0x3f   : > { %1348 = vsyncadd (%p1466_p8), %s352_s10, 4294966784  ;;  %v529_v0 = vld [vmem:[%s1555_s8 + $0x78] sm:$0xff]  ;;  %v528_v1 = vld [vmem:[%s1555_s8 + $0x70] sm:$0xff]  ;;  %v407_v9 = vlaneseq  ;;  %s1738_s24 = scalar_lea.vmem [#allocation11], %s1543_s14  ;;  %s985_s30 = sshll.u32 %s1371_s21, 5 }
  0x40   : > { %530 = vmatpush.xpose.msra.mxu0 %v529_v0  ;;  %987 = vmatpush.xpose.msra.mxu2 %v529_v0  ;;  %v527_v2 = vld [vmem:[%s1555_s8 + $0x68] sm:$0xff]  ;;  %v526_v3 = vld [vmem:[%s1555_s8 + $0x60] sm:$0xff]  ;;  %v525_v4 = vld [vmem:[%s1555_s8 + $0x58] sm:$0xff]  ;;  %s755_s11 = sshll.u32 %s1738_s24, 4  ;;  %s754_s27 = scalar_lea.hbm %s1848_s5, %s985_s30  ;;  %s756_s11 = int_to_ptr.vmem [resolvable:$true] %s755_s11 }
  0x41   : > { %988 = vmatpush.xpose.msra.mxu3 %v529_v0  ;;  %v524_v5 = vld [vmem:[%s1555_s8 + $0x50] sm:$0xff]  ;;  %v523_v6 = vld [vmem:[%s1555_s8 + $0x48] sm:$0xff]  ;;  %v522_v7 = vld [vmem:[%s1555_s8 + $0x40] sm:$0xff]  ;;  %v1581_v11 = vand.u32 127, %v407_v9  ;;  %s757_s16 = sshll.u32 %s754_s27, 4  ;;  %s722_s28 = scalar_lea.sflag [#allocation12], %s1540_s7  ;;  %s758_s16 = int_to_ptr.hbm [resolvable:$true] %s757_s16 }
  0x42   : > { %v521_v8 = vld [vmem:[%s1555_s8 + $0x38] sm:$0xff]  ;;  %v520_v10 = vld [vmem:[%s1555_s8 + $0x30] sm:$0xff]  ;;  %v410_v12 = vld [vmem:[%s1565_s13] sm:$0xff]  ;;  %s1271_s29 = sshra.s32 %s758_s16, 4  ;;  %s1272_s29 = int_to_ptr.hbm [resolvable:$true] %s1271_s29 }
  0x43   : > { %vm409_vm0 = vcmp.lt.s32.totalorder %v1581_v11, 16  ;;  %v519_v13 = vld [vmem:[%s1555_s8 + $0x28] sm:$0xff]  ;;  %v518_v16 = vld [vmem:[%s1555_s8 + $0x20] sm:$0xff]  ;;  %v517_v18 = vld [vmem:[%s1555_s8 + $0x18] sm:$0xff]  ;;  %s1273_s26 = scalar_lea.hbm %s1272_s29, 32  ;;  %p1278_p7 = scmp.lt.s32.totalorder %s1272_s29, %s1848_s5 }
  0x44   : > { %531 = vmatpush.xpose.msra.mxu0 %v528_v1  ;;  %989 = vmatpush.xpose.msra.mxu2 %v528_v1  ;;  %v414_v14 = vsel %vm409_vm0, %v410_v12, -inf  ;;  %v411_v15 = vld [vmem:[%s1565_s13 + $0x8] sm:$0xff]  ;;  %v516_v19 = vld [vmem:[%s1555_s8 + $0x10] sm:$0xff]  ;;  %v514_v21 = vld [vmem:[%s1555_s8] sm:$0xff]  ;;  %p1274_p4 = scmp.ne.s32.totalorder %s1272_s29, %s1273_s26 }
  0x45   : > { %990 = vmatpush.xpose.msra.mxu3 %v528_v1  ;;  %418 = vmax.xlane.f32.xlu0 %v414_v14  ;;  %v415_v17 = vsel %vm409_vm0, %v411_v15, -inf  ;;  %v515_v20 = vld [vmem:[%s1555_s8 + $0x8] sm:$0xff]  ;;  %v510_v22 = vld [vmem:[%s1547_s17] sm:$0xff]  ;;  %v512_v24 = vld [vmem:[%s1547_s17 + $0x10] sm:$0xff] }
  0x46   : > { %v511_v23 = vld [vmem:[%s1547_s17 + $0x8] sm:$0xff]  ;;  %v513_v25 = vld [vmem:[%s1547_s17 + $0x18] sm:$0xff]  ;;  %v412_v34 = vld [vmem:[%s1565_s13 + $0x10] sm:$0xff]  ;;  %p1275_p5 = pnand %p1274_p4, %p1470_p9  ;;  %s1277_s17 = scalar_lea.hbm %s1848_s5, 64 }
  0x47   : > { %v416_v40 = vsel %vm409_vm0, %v412_v34, -inf  ;;  %v413_v42 = vld [vmem:[%s1565_s13 + $0x18] sm:$0xff]  ;;  %v681_v57 = vld [vmem:[%s1561_s9 + $0x70] sm:$0xff]  ;;  %v680_v61 = vld [vmem:[%s1561_s9 + $0x68] sm:$0xff]  ;;  %p1279_p8 = scmp.lt.s32.totalorder %s1277_s17, %s1273_s26 }
  0x48   : > { %532 = vmatpush.xpose.msra.mxu0 %v527_v2  ;;  %991 = vmatpush.xpose.msra.mxu2 %v527_v2  ;;  %v417_v45 = vsel %vm409_vm0, %v413_v42, -inf  ;;  %v682_v56 = vld [vmem:[%s1561_s9 + $0x78] sm:$0xff]  ;;  %v679_v1 = vld [vmem:[%s1561_s9 + $0x60] sm:$0xff]  ;;  %v677_v15 = vld [vmem:[%s1561_s9 + $0x50] sm:$0xff]  ;;  %p1276_p6 = pneg %p1275_p5 }
  0x49   : > { %992 = vmatpush.xpose.msra.mxu3 %v527_v2  ;;  %683 = vmatpush.msra.mxu1 %v682_v56  ;;  %p1280_p10 = por %p1279_p8, %p1278_p7 }
  0x4b   : > { %684 = vmatpush.msra.mxu1 %v681_v57  ;;  %p1281_p13 = pnand %p1280_p10, %p1276_p6 }
  0x4c   : > { %533 = vmatpush.xpose.msra.mxu0 %v526_v3  ;;  %993 = vmatpush.xpose.msra.mxu2 %v526_v3 }
  0x4d   : > { %994 = vmatpush.xpose.msra.mxu3 %v526_v3  ;;  %420 = vmax.xlane.f32.xlu0 %v415_v17  ;;  %v678_v3 = vld [vmem:[%s1561_s9 + $0x58] sm:$0xff] }
  0x4e   : > { %685 = vmatpush.msra.mxu1 %v680_v61 }
  0x50   : > { %534 = vmatpush.xpose.msra.mxu0 %v525_v4  ;;  %995 = vmatpush.xpose.msra.mxu2 %v525_v4 }
  0x51   : > { %996 = vmatpush.xpose.msra.mxu3 %v525_v4  ;;  %686 = vmatpush.msra.mxu1 %v679_v1 }
  0x53   : > { %687 = vmatpush.msra.mxu1 %v678_v3 }
  0x54   : > { %535 = vmatpush.xpose.msra.mxu0 %v524_v5  ;;  %997 = vmatpush.xpose.msra.mxu2 %v524_v5 }
  0x55   : > { %998 = vmatpush.xpose.msra.mxu3 %v524_v5  ;;  %688 = vmatpush.msra.mxu1 %v677_v15 }
  0x58   : > { %536 = vmatpush.xpose.msra.mxu0 %v523_v6  ;;  %999 = vmatpush.xpose.msra.mxu2 %v523_v6 }
  0x59   : > { %1000 = vmatpush.xpose.msra.mxu3 %v523_v6 }
  0x5c   : > { %537 = vmatpush.xpose.msra.mxu0 %v522_v7  ;;  %1001 = vmatpush.xpose.msra.mxu2 %v522_v7 }
  0x5d   : > { %1002 = vmatpush.xpose.msra.mxu3 %v522_v7 }
  0x60   : > { %538 = vmatpush.xpose.msra.mxu0 %v521_v8  ;;  %1003 = vmatpush.xpose.msra.mxu2 %v521_v8 }
  0x61   : > { %1004 = vmatpush.xpose.msra.mxu3 %v521_v8 }
  0x64   : > { %539 = vmatpush.xpose.msra.mxu0 %v520_v10  ;;  %1005 = vmatpush.xpose.msra.mxu2 %v520_v10 }
  0x65   : > { %1006 = vmatpush.xpose.msra.mxu3 %v520_v10 }
  0x68   : > { %540 = vmatpush.xpose.msra.mxu0 %v519_v13  ;;  %1007 = vmatpush.xpose.msra.mxu2 %v519_v13 }
  0x69   : > { %1008 = vmatpush.xpose.msra.mxu3 %v519_v13 }
  0x6c   : > { %541 = vmatpush.xpose.msra.mxu0 %v518_v16  ;;  %1009 = vmatpush.xpose.msra.mxu2 %v518_v16 }
  0x6d   : > { %1010 = vmatpush.xpose.msra.mxu3 %v518_v16  ;;  %v676_v16 = vld [vmem:[%s1561_s9 + $0x48] sm:$0xff] }
  0x6e   : > { %689 = vmatpush.msra.mxu1 %v676_v16 }
  0x70   : > { %542 = vmatpush.xpose.msra.mxu0 %v517_v18  ;;  %1011 = vmatpush.xpose.msra.mxu2 %v517_v18 }
  0x71   : > { %1012 = vmatpush.xpose.msra.mxu3 %v517_v18  ;;  %v674_v18 = vld [vmem:[%s1561_s9 + $0x38] sm:$0xff] }
  0x74   : > { %543 = vmatpush.xpose.msra.mxu0 %v516_v19  ;;  %1013 = vmatpush.xpose.msra.mxu2 %v516_v19 }
  0x75   : > { %1014 = vmatpush.xpose.msra.mxu3 %v516_v19  ;;  %v673_v19 = vld [vmem:[%s1561_s9 + $0x30] sm:$0xff] }
  0x78   : > { %544 = vmatpush.xpose.msra.mxu0 %v515_v20  ;;  %1015 = vmatpush.xpose.msra.mxu2 %v515_v20 }
  0x79   : > { %1016 = vmatpush.xpose.msra.mxu3 %v515_v20  ;;  %v672_v20 = vld [vmem:[%s1561_s9 + $0x28] sm:$0xff] }
  0x7c   : > { %545 = vmatpush.xpose.msra.mxu0 %v514_v21  ;;  %1017 = vmatpush.xpose.msra.mxu2 %v514_v21 }
  0x7d   : > { %1018 = vmatpush.xpose.msra.mxu3 %v514_v21  ;;  %v671_v21 = vld [vmem:[%s1561_s9 + $0x20] sm:$0xff] }
  0x7f   : > { %546 = vmatmul.f32.vlgmr.msra.gmra.mxu0 %v510_v22  ;;  %549 = vmatmul.f32.vlgmr.msra.gmra.mxu2 %v511_v23  ;;  %v670_v22 = vld [vmem:[%s1561_s9 + $0x18] sm:$0xff] }
  0x80   : > { %552 = vmatmul.f32.vlgmr.msra.gmra.mxu3 %v512_v24 }
  0x88   : > { %555 = vmatmul.f32.gmra.mxu3 %v513_v25  ;;  %v669_v25 = vld [vmem:[%s1561_s9 + $0x10] sm:$0xff] }
  0xb8   : > { %v419_v26 = vpop.xlane.xlu0 %418 }
  0xb9   : > { %v426_v38 = vsub.f32 %v414_v14, %v419_v26  ;;  %v668_v26 = vld [vmem:[%s1561_s9 + $0x8] sm:$0xff] }
  0xbb   : > { %v430_v43 = vmul.f32 1.442695, %v426_v38 }
  0xc0   : > { %v421_v27 = vpop.xlane.xlu0 %420 }
  0xc1   : > { %v427_v30 = vsub.f32 %v415_v17, %v421_v27  ;;  %v675_v17 = vld [vmem:[%s1561_s9 + $0x40] sm:$0xff] }
  0xc2   : > { %690 = vmatpush.msra.mxu1 %v675_v17  ;;  %v667_v27 = vld [vmem:[%s1561_s9] sm:$0xff] }
  0xc3   : > { %v432_v33 = vmul.f32 1.442695, %v427_v30 }
  0xc4   : > { %691 = vmatpush.msra.mxu1 %v674_v18 }
  0xc5   : > { %1105 = vpow2.f32 %v432_v33 }
  0xc6   : > { %1107 = vpow2.f32 %v430_v43  ;;  %692 = vmatpush.msra.mxu1 %v673_v19 }
  0xc8   : > { %693 = vmatpush.msra.mxu1 %v672_v20 }
  0xca   : > { %694 = vmatpush.msra.mxu1 %v671_v21 }
  0xcb   : > { %v1612_v46 = vpop.eup %1105 }
  0xcc   : > { %v1617_v49 = vpop.eup %1107  ;;  %695 = vmatpush.msra.mxu1 %v670_v22 }
  0xce   : > { %696 = vmatpush.msra.mxu1 %v669_v25 }
  0xd0   : > { %697 = vmatpush.msra.mxu1 %v668_v26 }
  0xd2   : > { %698 = vmatpush.msra.mxu1 %v667_v27 }
  0xfc   : > { %v547_v28 = vpop.f32.mrf.mxu0 }
  0xfd   : > { %v559_v29 = vmul.f32 0.17677669, %v547_v28 }
  0xff   : > { %v563_v31 = vsel %vm409_vm0, %v559_v29, -inf }
 0x100   : > { %567 = vmax.xlane.f32.xlu1 %v563_v31 }
 0x102   : > { %v550_v32 = vpop.f32.mrf.mxu2 }
 0x103   : > { %v560_v35 = vmul.f32 0.17677669, %v550_v32  ;;  %v553_v36 = vpop.f32.mrf.mxu3 }
 0x104   : > { %v561_v37 = vmul.f32 0.17677669, %v553_v36 }
 0x105   : > { %v564_v39 = vsel %vm409_vm0, %v560_v35, -inf }
 0x106   : > { %569 = vmax.xlane.f32.xlu2 %v564_v39  ;;  %v565_v41 = vsel %vm409_vm0, %v561_v37, -inf }
 0x107   : > { %571 = vmax.xlane.f32.xlu0 %v565_v41 }
 0x108   : > { %422 = vmax.xlane.f32.xlu1 %v416_v40 }
 0x10b   : > { %v556_v44 = vpop.f32.mrf.mxu3 }
 0x10c   : > { %v562_v47 = vmul.f32 0.17677669, %v556_v44 }
 0x10e   : > { %424 = vmax.xlane.f32.xlu2 %v417_v45  ;;  %v566_v48 = vsel %vm409_vm0, %v562_v47, -inf }
 0x10f   : > { %440 = vadd.xlane.f32.xlu0 %v1612_v46 }
 0x110   : > { %573 = vmax.xlane.f32.xlu1 %v566_v48 }
 0x116   : > { %438 = vadd.xlane.f32.xlu2 %v1617_v49 }
 0x173   : > { %v568_v50 = vpop.xlane.xlu1 %567 }
 0x174   : > { %v575_v51 = vsub.f32 %v563_v31, %v568_v50 }
 0x176   : > { %v579_v52 = vmul.f32 1.442695, %v575_v51 }
 0x178   : > { %1109 = vpow2.f32 %v579_v52 }
 0x179   : > { %v570_v53 = vpop.xlane.xlu2 %569 }
 0x17a   : > { %v576_v54 = vsub.f32 %v564_v39, %v570_v53  ;;  %v572_v59 = vpop.xlane.xlu0 %571 }
 0x17b   : > { %v423_v55 = vpop.xlane.xlu1 %422  ;;  %v577_v0 = vsub.f32 %v565_v41, %v572_v59 }
 0x17c   : > { %v581_v58 = vmul.f32 1.442695, %v576_v54  ;;  %v428_v60 = vsub.f32 %v416_v40, %v423_v55 }
 0x17d   : > { %v583_v5 = vmul.f32 1.442695, %v577_v0 }
 0x17e   : > { %v1623_v62 = vpop.eup %1109  ;;  %1111 = vpow2.f32 %v581_v58  ;;  %v434_v63 = vmul.f32 1.442695, %v428_v60 }
 0x17f   : > { %587 = vadd.xlane.f32.xlu1 %v1623_v62 }
 0x180   : > { %1113 = vpow2.f32 %v434_v63 }
 0x181   : > { %v425_v2 = vpop.xlane.xlu2 %424 }
 0x182   : > { %v429_v4 = vsub.f32 %v417_v45, %v425_v2  ;;  %v441_v23 = vpop.xlane.xlu0 %440 }
 0x183   : > { %v574_v6 = vpop.xlane.xlu1 %573  ;;  %vm465_vm1 = vweird.f32 %v441_v23  ;;  %v469_v39 = vand.u32 2147483647, %v441_v23  ;;  %v471_v40 = vand.u32 2147483648, %v441_v23 }
 0x184   : > { %v1628_v7 = vpop.eup %1111  ;;  %v436_v8 = vmul.f32 1.442695, %v429_v4  ;;  %v578_v9 = vsub.f32 %v566_v48, %v574_v6 }
 0x185   : > { %589 = vadd.xlane.f32.xlu0 %v1628_v7  ;;  %vm1668_vm7 = vcmp.eq.f32.partialorder %v469_v39, 8.507059e+37  ;;  %v472_v53 = vor.u32 1.1754944e-38, %v471_v40 }
 0x186   : > { %v1631_v10 = vpop.eup %1113  ;;  %1115 = vpow2.f32 %v436_v8  ;;  %v585_v11 = vmul.f32 1.442695, %v578_v9 }
 0x187   : > { %1117 = vpow2.f32 %v583_v5  ;;  %442 = vadd.xlane.f32.xlu2 %v1631_v10 }
 0x188   : > { %1119 = vpow2.f32 %v585_v11 }
 0x189   : > { %v439_v24 = vpop.xlane.xlu2 %438  ;;  %1121 = vrcp.f32 %v441_v23 }
 0x18a   : > { %1123 = vrcp.f32 %v439_v24  ;;  %vm451_vm3 = vweird.f32 %v439_v24  ;;  %v457_v44 = vand.u32 2147483648, %v439_v24  ;;  %v455_v48 = vand.u32 2147483647, %v439_v24 }
 0x18c   : > { %v1634_v12 = vpop.eup %1115  ;;  %v458_v57 = vor.u32 1.1754944e-38, %v457_v44  ;;  %vm456_vm9 = vcmp.eq.f32.partialorder %v455_v48, 8.507059e+37 }
 0x18d   : > { %v1636_v13 = vpop.eup %1117  ;;  %444 = vadd.xlane.f32.xlu1 %v1634_v12 }
 0x18e   : > { %v1639_v14 = vpop.eup %1119 }
 0x18f   : > { %593 = vadd.xlane.f32.xlu0 %v1639_v14  ;;  %591 = vadd.xlane.f32.xlu2 %v1636_v13  ;;  %v1122_v28 = vpop.eup %1121 }
 0x190   : > { %v1124_v29 = vpop.eup %1123  ;;  %v461_v30 = vmul.f32 %v1122_v28, %v441_v23  ;;  %vm466_vm2 = vweird.f32 %v1122_v28 }
 0x191   : > { %v447_v31 = vmul.f32 %v1124_v29, %v439_v24  ;;  %vm452_vm4 = vweird.f32 %v1124_v29  ;;  %vm1660_vm5 = vmor %vm465_vm1, %vm466_vm2 }
 0x192   : > { %v462_v33 = vsub.f32 1.0, %v461_v30  ;;  %vm1664_vm6 = vmor %vm451_vm3, %vm452_vm4 }
 0x193   : > { %v448_v34 = vsub.f32 1.0, %v447_v31 }
 0x194   : > { %v463_v35 = vmul.f32 %v1122_v28, %v462_v33 }
 0x195   : > { %v449_v36 = vmul.f32 %v1124_v29, %v448_v34 }
 0x196   : > { %v464_v43 = vadd.f32 %v1122_v28, %v463_v35 }
 0x197   : > { %v450_v47 = vadd.f32 %v1124_v29, %v449_v36 }
 0x198   : > { %v468_v56 = vsel %vm1660_vm5, %v1122_v28, %v464_v43 }
 0x199   : > { %v454_v59 = vsel %vm1664_vm6, %v1124_v29, %v450_v47  ;;  %v473_v2 = vsel %vm1668_vm7, %v472_v53, %v468_v56 }
 0x19a   : > { %v459_v9 = vsel %vm456_vm9, %v458_v57, %v454_v59  ;;  %v503_v20 = vmul.f32 %v1612_v46, %v473_v2 }
 0x19b   : > { %v502_v26 = vmul.f32 %v1617_v49, %v459_v9 }
 0x1f2   : > { %v588_v32 = vpop.xlane.xlu1 %587 }
 0x1f3   : > { %1125 = vrcp.f32 %v588_v32  ;;  %v606_v58 = vand.u32 2147483648, %v588_v32  ;;  %vm600_vm10 = vweird.f32 %v588_v32  ;;  %v604_v1 = vand.u32 2147483647, %v588_v32 }
 0x1f5   : > { %v607_v15 = vor.u32 1.1754944e-38, %v606_v58  ;;  %vm605_vm12 = vcmp.eq.f32.partialorder %v604_v1, 8.507059e+37 }
 0x1f8   : > { %v1654_v37 = vpop.xlane.xlu0 %589 }
 0x1f9   : > { %v1126_v38 = vpop.eup %1125  ;;  %1127 = vrcp.f32 %v1654_v37  ;;  %v620_v17 = vand.u32 2147483648, %v1654_v37  ;;  %v618_v19 = vand.u32 2147483647, %v1654_v37  ;;  %vm614_vm14 = vweird.f32 %v1654_v37 }
 0x1fa   : > { %v596_v41 = vmul.f32 %v1126_v38, %v588_v32  ;;  %v1657_v42 = vpop.xlane.xlu2 %442  ;;  %vm601_vm8 = vweird.f32 %v1126_v38 }
 0x1fb   : > { %1129 = vrcp.f32 %v1657_v42  ;;  %vm1694_vm11 = vmor %vm600_vm10, %vm601_vm8  ;;  %v483_v22 = vand.u32 2147483647, %v1657_v42  ;;  %v485_v23 = vand.u32 2147483648, %v1657_v42  ;;  %vm479_vm15 = vweird.f32 %v1657_v42 }
 0x1fc   : > { %v597_v50 = vsub.f32 1.0, %v596_v41  ;;  %vm1720_vm1 = vcmp.eq.f32.partialorder %v618_v19, 8.507059e+37  ;;  %v621_v49 = vor.u32 1.1754944e-38, %v620_v17 }
 0x1fd   : > { %vm1729_vm3 = vcmp.eq.f32.partialorder %v483_v22, 8.507059e+37  ;;  %v486_v35 = vor.u32 1.1754944e-38, %v485_v23 }
 0x1fe   : > { %v598_v54 = vmul.f32 %v1126_v38, %v597_v50 }
 0x1ff   : > { %v1672_v55 = vpop.eup %1127 }
 0x200   : > { %v610_v60 = vmul.f32 %v1672_v55, %v1654_v37  ;;  %v1680_v61 = vpop.xlane.xlu1 %444  ;;  %v599_v63 = vadd.f32 %v1126_v38, %v598_v54  ;;  %vm615_vm13 = vweird.f32 %v1672_v55 }
 0x201   : > { %v1682_v0 = vpop.eup %1129  ;;  %1131 = vrcp.f32 %v1680_v61  ;;  %vm1716_vm0 = vmor %vm614_vm14, %vm615_vm13  ;;  %vm493_vm4 = vweird.f32 %v1680_v61  ;;  %v497_v39 = vand.u32 2147483647, %v1680_v61  ;;  %v499_v40 = vand.u32 2147483648, %v1680_v61 }
 0x202   : > { %v611_v3 = vsub.f32 1.0, %v610_v60  ;;  %v475_v4 = vmul.f32 %v1682_v0, %v1657_v42  ;;  %v1689_v5 = vpop.xlane.xlu2 %591  ;;  %v1691_v6 = vpop.xlane.xlu0 %593  ;;  %v603_v11 = vsel %vm1694_vm11, %v1126_v38, %v599_v63  ;;  %vm480_vm2 = vweird.f32 %v1682_v0 }
 0x203   : > { %1133 = vrcp.f32 %v1689_v5  ;;  %v608_v24 = vsel %vm605_vm12, %v607_v15, %v603_v11  ;;  %vm1747_vm5 = vmor %vm479_vm15, %vm480_vm2  ;;  %v632_v50 = vand.u32 2147483647, %v1689_v5  ;;  %v634_v51 = vand.u32 2147483648, %v1689_v5 }
 0x204   : > { %v612_v16 = vmul.f32 %v1672_v55, %v611_v3  ;;  %v476_v18 = vsub.f32 1.0, %v475_v4  ;;  %1135 = vrcp.f32 %v1691_v6  ;;  %v651_v27 = vmul.f32 %v1623_v62, %v608_v24 }
 0x205   : > { %vm628_vm9 = vweird.f32 %v1689_v5  ;;  %v646_v56 = vand.u32 2147483647, %v1691_v6  ;;  %v648_v57 = vand.u32 2147483648, %v1691_v6  ;;  %vm498_vm11 = vcmp.eq.f32.partialorder %v497_v39, 8.507059e+37 }
 0x206   : > { %v477_v21 = vmul.f32 %v1682_v0, %v476_v18  ;;  %v613_v46 = vadd.f32 %v1672_v55, %v612_v16  ;;  %v659_v62 = vadd.f32 %v651_v27, %v502_v26  ;;  %v500_v63 = vor.u32 1.1754944e-38, %v499_v40 }
 0x207   : > { %v1132_v25 = vpop.eup %1131  ;;  %vm633_vm13 = vcmp.eq.f32.partialorder %v632_v50, 8.507059e+37  ;;  %vm642_vm14 = vweird.f32 %v1691_v6  ;;  %v649_v4 = vor.u32 1.1754944e-38, %v648_v57 }
 0x208   : > { %v489_v28 = vmul.f32 %v1132_v25, %v1680_v61  ;;  %v478_v32 = vadd.f32 %v1682_v0, %v477_v21  ;;  %v617_v33 = vsel %vm1716_vm0, %v1672_v55, %v613_v46  ;;  %663 = vst [vmem:[%s1738_s24] sm:$0xff] %v659_v62  ;;  %699 = vmatmul.f32.vlgmr.msra.gmra.mxu1 %v659_v62  ;;  %vm494_vm6 = vweird.f32 %v1132_v25 }
 0x209   : > { %v1134_v31 = vpop.eup %1133  ;;  %v622_v41 = vsel %vm1720_vm1, %v621_v49, %v617_v33  ;;  %vm1760_vm8 = vmor %vm493_vm4, %vm494_vm6  ;;  %vm647_vm0 = vcmp.eq.f32.partialorder %v646_v56, 8.507059e+37 }
 0x20a   : > { %v490_v36 = vsub.f32 1.0, %v489_v28  ;;  %v624_v37 = vmul.f32 %v1134_v31, %v1689_v5  ;;  %v1136_v38 = vpop.eup %1135  ;;  %v482_v48 = vsel %vm1747_vm5, %v1682_v0, %v478_v32  ;;  %v652_v52 = vmul.f32 %v1628_v7, %v622_v41 }
 0x20b   : > { %v638_v47 = vmul.f32 %v1136_v38, %v1691_v6  ;;  %vm629_vm7 = vweird.f32 %v1134_v31  ;;  %vm643_vm10 = vweird.f32 %v1136_v38  ;;  %v487_v61 = vsel %vm1729_vm3, %v486_v35, %v482_v48 }
 0x20c   : > { %v491_v44 = vmul.f32 %v1132_v25, %v490_v36  ;;  %v625_v45 = vsub.f32 1.0, %v624_v37  ;;  %v660_v58 = vadd.f32 %v652_v52, %v503_v20  ;;  %vm630_vm12 = vmor %vm628_vm9, %vm629_vm7  ;;  %v635_v0 = vor.u32 1.1754944e-38, %v634_v51 }
 0x20d   : > { %v639_v54 = vsub.f32 1.0, %v638_v47  ;;  %vm644_vm15 = vmor %vm642_vm14, %vm643_vm10  ;;  %v504_v8 = vmul.f32 %v1631_v10, %v487_v61 }
 0x20e   : > { %v492_v42 = vadd.f32 %v1132_v25, %v491_v44  ;;  %v626_v53 = vmul.f32 %v1134_v31, %v625_v45  ;;  %664 = vst [vmem:[%s1738_s24 + $0x8] sm:$0xff] %v660_v58 }
 0x20f   : > { %v640_v60 = vmul.f32 %v1136_v38, %v639_v54 }
 0x210   : > { %v496_v7 = vsel %vm1760_vm8, %v1132_v25, %v492_v42  ;;  %v627_v59 = vadd.f32 %v1134_v31, %v626_v53  ;;  %702 = vmatmul.f32.gmra.mxu1 %v660_v58 }
 0x211   : > { %v641_v1 = vadd.f32 %v1136_v38, %v640_v60  ;;  %v501_v3 = vsel %vm498_vm11, %v500_v63, %v496_v7 }
 0x212   : > { %v631_v2 = vsel %vm630_vm12, %v1134_v31, %v627_v59  ;;  %v505_v6 = vmul.f32 %v1634_v12, %v501_v3 }
 0x213   : > { %v636_v5 = vsel %vm633_vm13, %v635_v0, %v631_v2  ;;  %v645_v11 = vsel %vm644_vm15, %v1136_v38, %v641_v1 }
 0x214   : > { %v653_v9 = vmul.f32 %v1636_v13, %v636_v5  ;;  %v650_v15 = vsel %vm647_vm0, %v649_v4, %v645_v11 }
 0x215   : > { %v654_v17 = vmul.f32 %v1639_v14, %v650_v15 }
 0x216   : > { %v661_v16 = vadd.f32 %v653_v9, %v504_v8 }
 0x217   : > { %v662_v18 = vadd.f32 %v654_v17, %v505_v6 }
 0x218   : > { %665 = vst [vmem:[%s1738_s24 + $0x10] sm:$0xff] %v661_v16  ;;  %705 = vmatmul.f32.gmra.mxu1 %v661_v16 }
 0x219   : > { %666 = vst [vmem:[%s1738_s24 + $0x18] sm:$0xff] %v662_v18 }
 0x220   : > { %708 = vmatmul.f32.gmra.mxu1 %v662_v18 }
 0x221   : > { %1284 = shalt.err (!%p1281_p13)
}
 0x222   : > { %s1383_s20 = smov 128   ;;  %s1384_s8 = smov 8  }
 0x223   : > { %1028 = dma.vmem_to_hbm [thread:$0]  (%p1470_p9), %s756_s11, 512, %s758_s16, %s722_s28, %s1383_s20, %s1383_s20, %s1384_s8  }
 0x224   : > { %s395_s9 = scalar_lea.vmem [#allocation10], %s1543_s14  ;;  %s735_s24 = scalar_lea.hbm %s1847_s4, %s985_s30 }
 0x225   : > { %s736_s25 = sshll.u32 %s395_s9, 4  ;;  %s738_s12 = sshll.u32 %s735_s24, 4  ;;  %s737_s25 = int_to_ptr.vmem [resolvable:$true] %s736_s25  ;;  %s739_s12 = int_to_ptr.hbm [resolvable:$true] %s738_s12 }
 0x226   : > { %s717_s11 = scalar_lea.sflag [#allocation4], %s1540_s7  ;;  %s1299_s27 = sshra.s32 %s739_s12, 4  ;;  %s1300_s27 = int_to_ptr.hbm [resolvable:$true] %s1299_s27 }
 0x227   : > { %s1301_s14 = scalar_lea.hbm %s1300_s27, 32  ;;  %s1305_s28 = scalar_lea.hbm %s1847_s4, 64 }
 0x228   : > { %p1302_p0 = scmp.ne.s32.totalorder %s1300_s27, %s1301_s14  ;;  %p1306_p3 = scmp.lt.s32.totalorder %s1300_s27, %s1847_s4 }
 0x229   : > { %p1307_p4 = scmp.lt.s32.totalorder %s1305_s28, %s1301_s14 }
 0x22a   : > { %p1303_p1 = pnand %p1302_p0, %p1470_p9 }
 0x22b   : > { %p1308_p5 = por %p1307_p4, %p1306_p3 }
 0x22c   : > { %p1304_p2 = pneg %p1303_p1 }
 0x22e   : > { %p1309_p6 = pnand %p1308_p5, %p1304_p2 }
 0x285   : > { %v700_v10 = vpop.f32.mrf.mxu1 }
 0x286   : > { %712 = vst [vmem:[%s395_s9] sm:$0xff] %v700_v10 }
 0x28d   : > { %v703_v12 = vpop.f32.mrf.mxu1 }
 0x28e   : > { %713 = vst [vmem:[%s395_s9 + $0x8] sm:$0xff] %v703_v12 }
 0x295   : > { %v706_v13 = vpop.f32.mrf.mxu1 }
 0x296   : > { %714 = vst [vmem:[%s395_s9 + $0x10] sm:$0xff] %v706_v13 }
 0x29d   : > { %v709_v14 = vpop.f32.mrf.mxu1 }
 0x29e   : > { %715 = vst [vmem:[%s395_s9 + $0x18] sm:$0xff] %v709_v14 }
 0x29f   : > { %1312 = shalt.err (!%p1309_p6)
}
 0x2a0   : > { %1027 = dma.vmem_to_hbm [thread:$0]  (%p1470_p9), %s737_s25, 512, %s739_s12, %s717_s11, %s1383_s20, %s1383_s20, %s1384_s8  }
 0x2a1 PF: > { %s772_s26 = sand.u32 1, %s1359_s18   ;;  %p1045_p7 = pnand %p953_p12, %p1477_p11 }
 0x2a2   : > { %s773_s15 = scalar_lea.sflag [#allocation4], %s772_s26 }
 0x2a3   : > { %p1046_p8 = pneg %p1045_p7 }
 0x2a5   : > { %1350 = dma.done.wait (%p1046_p8), %s773_s15, 512  }
 0x2a6   : > { %1352 = vsyncadd (%p1046_p8), %s773_s15, 4294966784  ;;  %s783_s0 = scalar_lea.sflag [#allocation12], %s772_s26 }
 0x2a7   : > { %1354 = dma.done.wait (%p1046_p8), %s783_s0, 512  }
 0x2a8   : > { %1356 = vsyncadd (%p1046_p8), %s783_s0, 4294966784  ;;  %s31_s23 = sadd.s32 1, %s1379_s23   ;;  %s1887_s6 = sld [smem:[#allocation18_spill]] }
 0x2a9   : > { %p28_p10 = scmp.ge.s32.totalorder %s31_s23, 4   ;;  %s1888_s20 = sld [smem:[#allocation20_spill]] }
 0x2aa   : > { %s1889_s17 = sld [smem:[#allocation19_spill]]  ;;  %s1890_s18 = smov %s1363_s19 }
 0x2ab   : > { %s1892_s21 = smov %s1375_s22 }
 0x2ac   :  { %30 = sbr.rel (!%p28_p10) target bundleno = 16 (0x10), region = 135 }
 0x2ae   : > { %s1891_s19 = smov %s1887_s6 }
 0x2b0   : > { %s1893_s22 = smov %s1889_s17 }
 0x2b1   :  { %789 = vsyncpa [#allocation3], 1 }
 0x2b2   :  { %791 = vsyncpa [#allocation3 + $0x1], 1 }
 0x2b3   :  { %792 = vsyncpa [#allocation6], 1 }
 0x2b4   :  { %794 = vsyncpa [#allocation6 + $0x1], 1 }
 0x2b5   :  { %795 = vsyncpa [#allocation9], 1 }
 0x2b6   :  { %797 = vsyncpa [#allocation9 + $0x1], 1 }
 0x2b7   :  { %798 = vsyncpa [#allocation4], 1 }
 0x2b8   :  { %800 = vsyncpa [#allocation4 + $0x1], 1 }
 0x2b9   :  { %801 = vsyncpa [#allocation12], 1 }
 0x2ba   :  { %803 = vsyncpa [#allocation12 + $0x1], 1 }

</bundles_post_ra>
